<compile_context>
chip_gen: v6e
topology: v6e:2x2x1
jax: 0.10.0
libtpu: 0.0.40
codegen_flags: <defaults>
</compile_context>

<pallas_src>
import jax
import jax.numpy as jnp
import numpy as np
from jax.experimental import pallas as pl
from jax.experimental.pallas import tpu as pltpu


def decoder_step_kernel(ids_ref, emb_ref, h0_ref, c0_ref,
                        w_ref, b_ref, wfc_ref, bfc_ref,
                        pred_ref, hn_ref, cn_ref):
    """One full decoder step: embedding gather + stacked LSTM (seq_len == 1) + fc.

    ids_ref : (B, 1) int32       token ids (PyTorch's x.unsqueeze(1))
    emb_ref : (V, E)             embedding table
    h0_ref  : (L, B, H)          incoming hidden state
    c0_ref  : (L, B, H)          incoming cell state
    w_ref   : (L, 2H, 4H)        per-layer [W_ih; W_hh] (pre-transposed), gate order (i,f,g,o)
    b_ref   : (L, 1, 4H)         folded biases (b_ih + b_hh)
    wfc_ref : (H, O)             fc weights (pre-transposed for h @ W)
    bfc_ref : (1, O)             fc bias
    pred_ref: (B, O)             logits
    hn_ref  : (L, B, H)          new hidden state (aliases h0 in HBM)
    cn_ref  : (L, B, H)          new cell state   (aliases c0 in HBM)
    """
    L, B, H = h0_ref.shape
    V = emb_ref.shape[0]

    # ---- Embedding lookup as one-hot @ table (uses the otherwise-idle MXU). ----
    # Dropout on the embedding is identity in eval mode.
    lane_ids = jax.lax.broadcasted_iota(jnp.int32, (B, V), 1)           # (B, V)
    one_hot = (lane_ids == ids_ref[...]).astype(jnp.float32)            # (B, V)
    x = jnp.dot(one_hot, emb_ref[...], preferred_element_type=jnp.float32)  # (B, E==H)

    # ---- Stacked LSTM cells (seq_len == 1), small static layer unroll. ----
    for layer in range(L):
        h = h0_ref[layer]                              # (B, H)
        c = c0_ref[layer]                              # (B, H)

        # Single fused-gate matmul per layer: (B, 2H) @ (2H, 4H) -> (B, 4H) lane-dense.
        xh = jnp.concatenate([x, h], axis=-1)          # (B, 2H)
        gates = (jnp.dot(xh, w_ref[layer], preferred_element_type=jnp.float32)
                 + b_ref[layer])                       # (B, 4H)

        # Two full-width EUP passes instead of four quarter-width ones.
        sig = jax.nn.sigmoid(gates)
        th = jnp.tanh(gates)
        i = sig[:, 0 * H:1 * H]
        f = sig[:, 1 * H:2 * H]
        g = th[:, 2 * H:3 * H]
        o = sig[:, 3 * H:4 * H]

        c_new = f * c + i * g
        h_new = o * jnp.tanh(c_new)

        hn_ref[layer] = h_new
        cn_ref[layer] = c_new
        x = h_new                                      # inter-layer dropout == identity (eval)

    # ---- Fused output projection (fc) on the top-layer hidden state. ----
    pred_ref[...] = (jnp.dot(x, wfc_ref[...], preferred_element_type=jnp.float32)
                     + bfc_ref[...])


def decoder_forward(x_ids, hidden, cell, params):
    """Mirrors Decoder.forward(x, hidden, cell) in eval mode.

    x_ids       : (B,) int32 token ids (PyTorch unsqueezes to (B, 1); seq_len == 1)
    hidden, cell: (L, B, H)
    returns (predictions (B, O), hidden (L, B, H), cell (L, B, H))
    """
    L, B, H = hidden.shape
    O = params["w_fc"].shape[1]
    ids_col = x_ids.reshape(B, 1).astype(jnp.int32)    # == x.unsqueeze(1)

    vmem = pl.BlockSpec(memory_space=pltpu.MemorySpace.VMEM)
    pred, h_n, c_n = pl.pallas_call(
        decoder_step_kernel,
        out_shape=(
            jax.ShapeDtypeStruct((B, O), jnp.float32),
            jax.ShapeDtypeStruct((L, B, H), jnp.float32),
            jax.ShapeDtypeStruct((L, B, H), jnp.float32),
        ),
        in_specs=[vmem] * 8,
        out_specs=(vmem, vmem, vmem),
        # hidden -> h_n, cell -> c_n: in-place recurrent-state update in the decode loop.
        input_output_aliases={2: 1, 3: 2},
    )(ids_col, params["embedding"], hidden, cell,
      params["w_cat"], params["b"], params["w_fc"], params["b_fc"])
    return pred, h_n, c_n


def init_params(key, input_size, embedding_size, hidden_size, output_size, num_layers):
    E, H, O, L = embedding_size, hidden_size, output_size, num_layers
    # TODO(synk): the fused per-layer [W_ih; W_hh] slab assumes embedding_size == hidden_size
    # (true for this decoder config); a separate layer-0 slab would be needed otherwise.
    assert E == H, "fused weight slab requires embedding_size == hidden_size"
    ks = jax.random.split(key, 6)
    bound = 1.0 / np.sqrt(H)

    def u(k, shape):
        return jax.random.uniform(k, shape, jnp.float32, -bound, bound)

    return dict(
        embedding=jax.random.normal(ks[0], (input_size, E), jnp.float32),
        # Per-layer fused weights: rows 0..H = W_ih^T (layer 0: over the embedding),
        # rows H..2H = W_hh^T; gate order (i, f, g, o) along the 4H output dim.
        w_cat=u(ks[1], (L, 2 * H, 4 * H)),
        # Folded bias: b_ih + b_hh.
        b=u(ks[2], (L, 1, 4 * H)) + u(ks[3], (L, 1, 4 * H)),
        w_fc=u(ks[4], (H, O)),
        b_fc=u(ks[5], (1, O)),
    )


def _reference_forward(x_ids, hidden, cell, params):
    """Pure-JAX reference of Embedding + stacked LSTM (seq_len == 1) + Linear."""
    emb = params["embedding"][x_ids]
    L, _, H = hidden.shape
    x = emb
    hs, cs = [], []
    for l in range(L):
        w_ih = params["w_cat"][l, :H]
        w_hh = params["w_cat"][l, H:]
        gates = x @ w_ih + hidden[l] @ w_hh + params["b"][l]
        i = jax.nn.sigmoid(gates[:, 0:H])
        f = jax.nn.sigmoid(gates[:, H:2 * H])
        g = jnp.tanh(gates[:, 2 * H:3 * H])
        o = jax.nn.sigmoid(gates[:, 3 * H:4 * H])
        c_new = f * cell[l] + i * g
        h_new = o * jnp.tanh(c_new)
        hs.append(h_new)
        cs.append(c_new)
        x = h_new
    pred = x @ params["w_fc"] + params["b_fc"]
    return pred, jnp.stack(hs), jnp.stack(cs)


if __name__ == "__main__":
    VOCAB = 128     # input_size (target vocabulary); lane-dense one-hot gather
    EMB = 32        # embedding_size
    HIDDEN = 32     # hidden_size (4H == 128 -> lane-dense fused-gate matmuls)
    OUT = 128       # output_size (lane-dense logits)
    LAYERS = 2      # num_layers
    B = 2           # batch (sublane headroom allows up to 8 streams at ~same latency)

    key = jax.random.PRNGKey(0)
    k_params, k_ids, k_h, k_c = jax.random.split(key, 4)
    params = init_params(k_params, VOCAB, EMB, HIDDEN, OUT, LAYERS)
    x_ids = jax.random.randint(k_ids, (B,), 0, VOCAB, dtype=jnp.int32)
    hidden = jax.random.normal(k_h, (LAYERS, B, HIDDEN), jnp.float32)
    cell = jax.random.normal(k_c, (LAYERS, B, HIDDEN), jnp.float32)

    pred, h_n, c_n = jax.jit(decoder_forward)(x_ids, hidden, cell, params)
    pred = jax.block_until_ready(pred)
    h_n = jax.block_until_ready(h_n)
    c_n = jax.block_until_ready(c_n)

    ref_pred, ref_h, ref_c = _reference_forward(x_ids, hidden, cell, params)
    assert pred.shape == (B, OUT)
    assert h_n.shape == (LAYERS, B, HIDDEN)
    assert c_n.shape == (LAYERS, B, HIDDEN)
    np.testing.assert_allclose(np.asarray(pred), np.asarray(ref_pred), rtol=2e-5, atol=2e-5)
    np.testing.assert_allclose(np.asarray(h_n), np.asarray(ref_h), rtol=2e-5, atol=2e-5)
    np.testing.assert_allclose(np.asarray(c_n), np.asarray(ref_c), rtol=2e-5, atol=2e-5)

    print("KERNEL_OK")
</pallas_src>

<mosaic_0001>
module attributes {stable_mosaic.version = 11 : i64} {
  func.func @decoder_step_kernel(%arg0: memref<2x1xi32, #tpu.memory_space<vmem>>, %arg1: memref<128x32xf32, #tpu.memory_space<vmem>>, %arg2: memref<2x2x32xf32, #tpu.memory_space<vmem>>, %arg3: memref<2x2x32xf32, #tpu.memory_space<vmem>>, %arg4: memref<2x64x128xf32, #tpu.memory_space<vmem>>, %arg5: memref<2x1x128xf32, #tpu.memory_space<vmem>>, %arg6: memref<32x128xf32, #tpu.memory_space<vmem>>, %arg7: memref<1x128xf32, #tpu.memory_space<vmem>>, %arg8: memref<2x128xf32, #tpu.memory_space<vmem>>, %arg9: memref<2x2x32xf32, #tpu.memory_space<vmem>>, %arg10: memref<2x2x32xf32, #tpu.memory_space<vmem>>) attributes {dimension_semantics = [], scalar_prefetch = 0 : i64, scratch_operands = 0 : i64, tpu.core_type = #tpu.core_type<tc>} {
    %0 = tpu.iota {dimensions = array<i32: 1>} : vector<2x128xi32>
    %c0 = arith.constant 0 : index
    %c0_0 = arith.constant 0 : index
    %1 = vector.load %arg0[%c0, %c0_0] : memref<2x1xi32, #tpu.memory_space<vmem>>, vector<2x1xi32>
    %2 = vector.broadcast %1 : vector<2x1xi32> to vector<2x128xi32>
    %3 = arith.cmpi eq, %0, %2 : vector<2x128xi32>
    %4 = arith.extui %3 : vector<2x128xi1> to vector<2x128xi32>
    %5 = arith.sitofp %4 : vector<2x128xi32> to vector<2x128xf32>
    %c0_1 = arith.constant 0 : index
    %c0_2 = arith.constant 0 : index
    %6 = vector.load %arg1[%c0_1, %c0_2] : memref<128x32xf32, #tpu.memory_space<vmem>>, vector<128x32xf32>
    %cst = arith.constant dense<0.000000e+00> : vector<2x32xf32>
    %7 = tpu.matmul %5, %6, %cst {dimension_numbers = #tpu.dot_dimension_numbers<[1], [0], [0], [1], [0, 0, 1, 1], [], []>} : vector<2x128xf32>, vector<128x32xf32>, vector<2x32xf32> -> vector<2x32xf32>
    %c0_3 = arith.constant 0 : index
    %c0_4 = arith.constant 0 : index
    %c0_5 = arith.constant 0 : index
    %8 = vector.load %arg2[%c0_3, %c0_4, %c0_5] : memref<2x2x32xf32, #tpu.memory_space<vmem>>, vector<1x2x32xf32>
    %9 = vector.shape_cast %8 : vector<1x2x32xf32> to vector<2x32xf32>
    %c0_6 = arith.constant 0 : index
    %c0_7 = arith.constant 0 : index
    %c0_8 = arith.constant 0 : index
    %10 = vector.load %arg3[%c0_6, %c0_7, %c0_8] : memref<2x2x32xf32, #tpu.memory_space<vmem>>, vector<1x2x32xf32>
    %11 = vector.shape_cast %10 : vector<1x2x32xf32> to vector<2x32xf32>
    %12 = tpu.concatenate %7, %9 in 1 : vector<2x32xf32>, vector<2x32xf32> -> vector<2x64xf32>
    %c0_9 = arith.constant 0 : index
    %c0_10 = arith.constant 0 : index
    %c0_11 = arith.constant 0 : index
    %13 = vector.load %arg4[%c0_9, %c0_10, %c0_11] : memref<2x64x128xf32, #tpu.memory_space<vmem>>, vector<1x64x128xf32>
    %14 = vector.shape_cast %13 : vector<1x64x128xf32> to vector<64x128xf32>
    %cst_12 = arith.constant dense<0.000000e+00> : vector<2x128xf32>
    %15 = tpu.matmul %12, %14, %cst_12 {dimension_numbers = #tpu.dot_dimension_numbers<[1], [0], [0], [1], [0, 0, 1, 1], [], []>} : vector<2x64xf32>, vector<64x128xf32>, vector<2x128xf32> -> vector<2x128xf32>
    %c0_13 = arith.constant 0 : index
    %c0_14 = arith.constant 0 : index
    %c0_15 = arith.constant 0 : index
    %16 = vector.load %arg5[%c0_13, %c0_14, %c0_15] : memref<2x1x128xf32, #tpu.memory_space<vmem>>, vector<1x1x128xf32>
    %17 = vector.shape_cast %16 : vector<1x1x128xf32> to vector<1x128xf32>
    %18 = vector.broadcast %17 : vector<1x128xf32> to vector<2x128xf32>
    %19 = arith.addf %15, %18 : vector<2x128xf32>
    %20 = arith.negf %19 : vector<2x128xf32>
    %21 = math.exp %20 : vector<2x128xf32>
    %cst_16 = arith.constant 1.000000e+00 : f32
    %22 = vector.broadcast %cst_16 : f32 to vector<2x128xf32>
    %23 = arith.addf %22, %21 : vector<2x128xf32>
    %24 = arith.divf %22, %23 : vector<2x128xf32>
    %25 = math.tanh %19 : vector<2x128xf32>
    %26 = vector.extract_strided_slice %24 {offsets = [0, 0], sizes = [2, 32], strides = [1, 1]} : vector<2x128xf32> to vector<2x32xf32>
    %27 = vector.extract_strided_slice %24 {offsets = [0, 32], sizes = [2, 32], strides = [1, 1]} : vector<2x128xf32> to vector<2x32xf32>
    %28 = vector.extract_strided_slice %25 {offsets = [0, 64], sizes = [2, 32], strides = [1, 1]} : vector<2x128xf32> to vector<2x32xf32>
    %29 = vector.extract_strided_slice %24 {offsets = [0, 96], sizes = [2, 32], strides = [1, 1]} : vector<2x128xf32> to vector<2x32xf32>
    %30 = arith.mulf %27, %11 : vector<2x32xf32>
    %31 = arith.mulf %26, %28 : vector<2x32xf32>
    %32 = arith.addf %30, %31 : vector<2x32xf32>
    %33 = math.tanh %32 : vector<2x32xf32>
    %34 = arith.mulf %29, %33 : vector<2x32xf32>
    %c0_17 = arith.constant 0 : index
    %c0_18 = arith.constant 0 : index
    %c0_19 = arith.constant 0 : index
    %35 = vector.load %arg9[%c0_17, %c0_18, %c0_19] : memref<2x2x32xf32, #tpu.memory_space<vmem>>, vector<1x2x32xf32>
    %36 = vector.shape_cast %35 : vector<1x2x32xf32> to vector<2x32xf32>
    %37 = vector.shape_cast %34 : vector<2x32xf32> to vector<1x2x32xf32>
    tpu.vector_store %arg9[%c0_17, %c0_18, %c0_19], %37 {strides = array<i32>} : memref<2x2x32xf32, #tpu.memory_space<vmem>>, vector<1x2x32xf32>,
    %c0_20 = arith.constant 0 : index
    %c0_21 = arith.constant 0 : index
    %c0_22 = arith.constant 0 : index
    %38 = vector.load %arg10[%c0_20, %c0_21, %c0_22] : memref<2x2x32xf32, #tpu.memory_space<vmem>>, vector<1x2x32xf32>
    %39 = vector.shape_cast %38 : vector<1x2x32xf32> to vector<2x32xf32>
    %40 = vector.shape_cast %32 : vector<2x32xf32> to vector<1x2x32xf32>
    tpu.vector_store %arg10[%c0_20, %c0_21, %c0_22], %40 {strides = array<i32>} : memref<2x2x32xf32, #tpu.memory_space<vmem>>, vector<1x2x32xf32>,
    %c1 = arith.constant 1 : index
    %c0_23 = arith.constant 0 : index
    %c0_24 = arith.constant 0 : index
    %41 = vector.load %arg2[%c1, %c0_23, %c0_24] : memref<2x2x32xf32, #tpu.memory_space<vmem>>, vector<1x2x32xf32>
    %42 = vector.shape_cast %41 : vector<1x2x32xf32> to vector<2x32xf32>
    %c1_25 = arith.constant 1 : index
    %c0_26 = arith.constant 0 : index
    %c0_27 = arith.constant 0 : index
    %43 = vector.load %arg3[%c1_25, %c0_26, %c0_27] : memref<2x2x32xf32, #tpu.memory_space<vmem>>, vector<1x2x32xf32>
    %44 = vector.shape_cast %43 : vector<1x2x32xf32> to vector<2x32xf32>
    %45 = tpu.concatenate %34, %42 in 1 : vector<2x32xf32>, vector<2x32xf32> -> vector<2x64xf32>
    %c1_28 = arith.constant 1 : index
    %c0_29 = arith.constant 0 : index
    %c0_30 = arith.constant 0 : index
    %46 = vector.load %arg4[%c1_28, %c0_29, %c0_30] : memref<2x64x128xf32, #tpu.memory_space<vmem>>, vector<1x64x128xf32>
    %47 = vector.shape_cast %46 : vector<1x64x128xf32> to vector<64x128xf32>
    %cst_31 = arith.constant dense<0.000000e+00> : vector<2x128xf32>
    %48 = tpu.matmul %45, %47, %cst_31 {dimension_numbers = #tpu.dot_dimension_numbers<[1], [0], [0], [1], [0, 0, 1, 1], [], []>} : vector<2x64xf32>, vector<64x128xf32>, vector<2x128xf32> -> vector<2x128xf32>
    %c1_32 = arith.constant 1 : index
    %c0_33 = arith.constant 0 : index
    %c0_34 = arith.constant 0 : index
    %49 = vector.load %arg5[%c1_32, %c0_33, %c0_34] : memref<2x1x128xf32, #tpu.memory_space<vmem>>, vector<1x1x128xf32>
    %50 = vector.shape_cast %49 : vector<1x1x128xf32> to vector<1x128xf32>
    %51 = vector.broadcast %50 : vector<1x128xf32> to vector<2x128xf32>
    %52 = arith.addf %48, %51 : vector<2x128xf32>
    %53 = arith.negf %52 : vector<2x128xf32>
    %54 = math.exp %53 : vector<2x128xf32>
    %cst_35 = arith.constant 1.000000e+00 : f32
    %55 = vector.broadcast %cst_35 : f32 to vector<2x128xf32>
    %56 = arith.addf %55, %54 : vector<2x128xf32>
    %57 = arith.divf %55, %56 : vector<2x128xf32>
    %58 = math.tanh %52 : vector<2x128xf32>
    %59 = vector.extract_strided_slice %57 {offsets = [0, 0], sizes = [2, 32], strides = [1, 1]} : vector<2x128xf32> to vector<2x32xf32>
    %60 = vector.extract_strided_slice %57 {offsets = [0, 32], sizes = [2, 32], strides = [1, 1]} : vector<2x128xf32> to vector<2x32xf32>
    %61 = vector.extract_strided_slice %58 {offsets = [0, 64], sizes = [2, 32], strides = [1, 1]} : vector<2x128xf32> to vector<2x32xf32>
    %62 = vector.extract_strided_slice %57 {offsets = [0, 96], sizes = [2, 32], strides = [1, 1]} : vector<2x128xf32> to vector<2x32xf32>
    %63 = arith.mulf %60, %44 : vector<2x32xf32>
    %64 = arith.mulf %59, %61 : vector<2x32xf32>
    %65 = arith.addf %63, %64 : vector<2x32xf32>
    %66 = math.tanh %65 : vector<2x32xf32>
    %67 = arith.mulf %62, %66 : vector<2x32xf32>
    %c1_36 = arith.constant 1 : index
    %c0_37 = arith.constant 0 : index
    %c0_38 = arith.constant 0 : index
    %68 = vector.load %arg9[%c1_36, %c0_37, %c0_38] : memref<2x2x32xf32, #tpu.memory_space<vmem>>, vector<1x2x32xf32>
    %69 = vector.shape_cast %68 : vector<1x2x32xf32> to vector<2x32xf32>
    %70 = vector.shape_cast %67 : vector<2x32xf32> to vector<1x2x32xf32>
    tpu.vector_store %arg9[%c1_36, %c0_37, %c0_38], %70 {strides = array<i32>} : memref<2x2x32xf32, #tpu.memory_space<vmem>>, vector<1x2x32xf32>,
    %c1_39 = arith.constant 1 : index
    %c0_40 = arith.constant 0 : index
    %c0_41 = arith.constant 0 : index
    %71 = vector.load %arg10[%c1_39, %c0_40, %c0_41] : memref<2x2x32xf32, #tpu.memory_space<vmem>>, vector<1x2x32xf32>
    %72 = vector.shape_cast %71 : vector<1x2x32xf32> to vector<2x32xf32>
    %73 = vector.shape_cast %65 : vector<2x32xf32> to vector<1x2x32xf32>
    tpu.vector_store %arg10[%c1_39, %c0_40, %c0_41], %73 {strides = array<i32>} : memref<2x2x32xf32, #tpu.memory_space<vmem>>, vector<1x2x32xf32>,
    %c0_42 = arith.constant 0 : index
    %c0_43 = arith.constant 0 : index
    %74 = vector.load %arg6[%c0_42, %c0_43] : memref<32x128xf32, #tpu.memory_space<vmem>>, vector<32x128xf32>
    %cst_44 = arith.constant dense<0.000000e+00> : vector<2x128xf32>
    %75 = tpu.matmul %67, %74, %cst_44 {dimension_numbers = #tpu.dot_dimension_numbers<[1], [0], [0], [1], [0, 0, 1, 1], [], []>} : vector<2x32xf32>, vector<32x128xf32>, vector<2x128xf32> -> vector<2x128xf32>
    %c0_45 = arith.constant 0 : index
    %c0_46 = arith.constant 0 : index
    %76 = vector.load %arg7[%c0_45, %c0_46] : memref<1x128xf32, #tpu.memory_space<vmem>>, vector<1x128xf32>
    %77 = vector.broadcast %76 : vector<1x128xf32> to vector<2x128xf32>
    %78 = arith.addf %75, %77 : vector<2x128xf32>
    %c0_47 = arith.constant 0 : index
    %c0_48 = arith.constant 0 : index
    %79 = vector.load %arg8[%c0_47, %c0_48] : memref<2x128xf32, #tpu.memory_space<vmem>>, vector<2x128xf32>
    tpu.vector_store %arg8[%c0_47, %c0_48], %78 {strides = array<i32>} : memref<2x128xf32, #tpu.memory_space<vmem>>, vector<2x128xf32>,
    return
  }
}

</mosaic_0001>

<bundles_post_ra>
// kernel: decoder_forward.1
= control target key start
LH: loop header
LB: loop body
LE: loop exit
PB: predicated region body
PF: predicated region fallthrough
CT: control target
= control target key end

     0   :  { %16 = vsyncpa [#allocation3], 0  ;;  %s1128_s0 = inlined_call_operand.vmem [shape: s32[2,1], index: 0, kind: input, shape index: {}]   ;;  %s1129_s1 = inlined_call_operand.vmem [shape: f32[128,32], index: 1, kind: input, shape index: {}]   ;;  %s1130_s2 = inlined_call_operand.hbm [shape: f32[2,2,32], index: 2, kind: input, shape index: {}, may-alias: {2,9}]   ;;  %s1131_s3 = inlined_call_operand.hbm [shape: f32[2,2,32], index: 3, kind: input, shape index: {}, may-alias: {3,10}]   ;;  %s1132_s4 = inlined_call_operand.vmem [shape: f32[2,64,128], index: 4, kind: input, shape index: {}]   ;;  %s1133_s5 = inlined_call_operand.vmem [shape: f32[2,1,128], index: 5, kind: input, shape index: {}]   ;;  %s1134_s6 = inlined_call_operand.vmem [shape: f32[32,128], index: 6, kind: input, shape index: {}]   ;;  %s1135_s7 = inlined_call_operand.vmem [shape: f32[1,128], index: 7, kind: input, shape index: {}]   ;;  %s1136_s8 = inlined_call_operand.hbm [shape: f32[2,128], index: 8, kind: output, shape index: {0}]   ;;  %s1137_s9 = inlined_call_operand.hbm [shape: f32[2,2,32], index: 9, kind: output, shape index: {1}, may-alias: {2,9}]   ;;  %s1138_s10 = inlined_call_operand.hbm [shape: f32[2,2,32], index: 10, kind: output, shape index: {2}, may-alias: {3,10}]  }
   0x1   :  { %17 = vsyncpa [#allocation6], 0 }
   0x2   :  { %18 = vsyncpa [#allocation4], 0 }
   0x3   :  { %19 = vsyncpa [#allocation9], 0  ;;  %s844_s13 = smov [#allocation2]  }
   0x4   :  { %s29_s14 = sshll.u32 %s844_s13, 4  ;;  %s30_s14 = int_to_ptr.vmem [resolvable:$true] %s29_s14 }
   0x5   :  { %s744_s15 = scalar_lea.vmem %s30_s14, 64  ;;  %p749_p1 = scmp.lt.s32.totalorder %s30_s14, %s30_s14 }
   0x6   :  { %p745_p0 = scmp.ne.s32.totalorder %s30_s14, %s744_s15  ;;  %p750_p2 = scmp.lt.s32.totalorder %s744_s15, %s744_s15 }
   0x8   :  { %p751_p3 = por %p750_p2, %p749_p1 }
   0xa   :  { %p752_p4 = pnand %p751_p3, %p745_p0 }
   0xc   :  { %755 = shalt.err (!%p752_p4)
}
   0xd   :  { %s845_s16 = smov 32   ;;  %s846_s17 = smov 2  }
   0xe   :  { %35 = dma.hbm_to_vmem [thread:$0]  %s1130_s2, 64, %s30_s14, [#allocation3], %s845_s16, %s845_s16, %s846_s17  }
   0xf   :  { %s847_s20 = smov [#allocation5]  }
  0x10   :  { %s41_s21 = sshll.u32 %s847_s20, 4  ;;  %s42_s21 = int_to_ptr.vmem [resolvable:$true] %s41_s21 }
  0x11   :  { %s764_s22 = scalar_lea.vmem %s42_s21, 64  ;;  %p769_p6 = scmp.lt.s32.totalorder %s42_s21, %s42_s21 }
  0x12   :  { %p765_p5 = scmp.ne.s32.totalorder %s42_s21, %s764_s22  ;;  %p770_p7 = scmp.lt.s32.totalorder %s764_s22, %s764_s22 }
  0x14   :  { %p771_p8 = por %p770_p7, %p769_p6 }
  0x16   :  { %p772_p9 = pnand %p771_p8, %p765_p5 }
  0x18   :  { %775 = shalt.err (!%p772_p9)
}
  0x19   :  { %47 = dma.hbm_to_vmem [thread:$0]  %s1131_s3, 64, %s42_s21, [#allocation6], %s845_s16, %s845_s16, %s846_s17  }
  0x1a   :  { %836 = dma.done.wait [#allocation3], 64  }
  0x1b   :  { %837 = vsyncadd [#allocation3], 4294967232 }
  0x1c   :  { %838 = dma.done.wait [#allocation6], 64  }
  0x1d   :  { %839 = vsyncadd [#allocation6], 4294967232  ;;  %v848_v0 = vmov 0   ;;  %v849_v1 = vmov 0.0   ;;  %vm850_vm0 = vmmov 0   ;;  %v86_v3 = vld [vmem:[%s1129_s1 + $0x78] sm:$0xff]  ;;  %v62_v27 = vlaneseq }
  0x1e   :  { %719 = vset.pattern.permute.xlu0 %v848_v0  ;;  %622 = vmatprep.subr.mxu0 %v849_v1  ;;  %v64_v2 = vld [vmem:[%s1128_s0] sm:$0x3]  ;;  %v85_v4 = vld [vmem:[%s1129_s1 + $0x70] sm:$0xff]  ;;  %v84_v5 = vld [vmem:[%s1129_s1 + $0x68] sm:$0xff]  ;;  %v851_v30 = vmov 1.0   ;;  %vm163_vm2 = vcmask 261120  }
  0x1f   :  { %657 = vmatprep.subr.mxu1 %v849_v1  ;;  %654 = vmatprep.mubr.msk.f32.mxu0 %vm850_vm0, %v849_v1  ;;  %v83_v6 = vld [vmem:[%s1129_s1 + $0x60] sm:$0xff]  ;;  %v82_v8 = vld [vmem:[%s1129_s1 + $0x58] sm:$0xff]  ;;  %v171_v10 = vld [vmem:[%s1132_s4 + $0x30] sm:$0xff]  ;;  %v63_v28 = vand.u32 127, %v62_v27  ;;  %vm180_vm3 = vcmask 523264   ;;  %s852_s11 = smov 64  }
  0x20   :  { %673 = vmatprep.mubr.msk.f32.mxu1 %vm850_vm0, %v849_v1  ;;  %66 = vperm.xlu0 %719, %v64_v2   ;;  %v157_v7 = vld [vmem:[#allocation2] sm:$0x3]  ;;  %v172_v9 = vld [vmem:[%s1132_s4 + $0x38] sm:$0xff]  ;;  %v81_v11 = vld [vmem:[%s1129_s1 + $0x50] sm:$0xff]  ;;  %vm286_vm4 = vcmask 254976   ;;  %s853_s15 = smov 96  }
  0x21   :  { %623 = vmatpush3.msra.mxu0 %v86_v3  ;;  %658 = vmatpush3.msra.mxu1 %v172_v9  ;;  %v170_v12 = vld [vmem:[%s1132_s4 + $0x28] sm:$0xff]  ;;  %v169_v14 = vld [vmem:[%s1132_s4 + $0x20] sm:$0xff]  ;;  %v168_v16 = vld [vmem:[%s1132_s4 + $0x18] sm:$0xff] }
  0x22   :  { %624 = vmatprep.subr.mxu0 %v849_v1  ;;  %659 = vmatprep.subr.mxu1 %v849_v1  ;;  %v80_v13 = vld [vmem:[%s1129_s1 + $0x48] sm:$0xff]  ;;  %v79_v15 = vld [vmem:[%s1129_s1 + $0x40] sm:$0xff]  ;;  %v78_v17 = vld [vmem:[%s1129_s1 + $0x38] sm:$0xff] }
  0x23   :  { %625 = vmatpush3.msra.mxu0 %v85_v4  ;;  %660 = vmatpush3.msra.mxu1 %v171_v10  ;;  %v167_v18 = vld [vmem:[%s1132_s4 + $0x10] sm:$0xff]  ;;  %v166_v20 = vld [vmem:[%s1132_s4 + $0x8] sm:$0xff]  ;;  %v75_v22 = vld [vmem:[%s1129_s1 + $0x20] sm:$0xff] }
  0x24   :  { %626 = vmatprep.subr.mxu0 %v849_v1  ;;  %160 = vrot.lane.b32.xlu0 %v157_v7, %s845_s16  ;;  %v77_v19 = vld [vmem:[%s1129_s1 + $0x30] sm:$0xff]  ;;  %v76_v21 = vld [vmem:[%s1129_s1 + $0x28] sm:$0xff]  ;;  %v74_v23 = vld [vmem:[%s1129_s1 + $0x18] sm:$0xff] }
  0x25   :  { %627 = vmatpush3.msra.mxu0 %v84_v5  ;;  %661 = vmatprep.subr.mxu1 %v849_v1  ;;  %v73_v24 = vld [vmem:[%s1129_s1 + $0x10] sm:$0xff]  ;;  %v72_v25 = vld [vmem:[%s1129_s1 + $0x8] sm:$0xff]  ;;  %v71_v26 = vld [vmem:[%s1129_s1] sm:$0xff] }
  0x26   :  { %628 = vmatprep.subr.mxu0 %v849_v1  ;;  %662 = vmatpush3.msra.mxu1 %v170_v12  ;;  %v165_v31 = vld [vmem:[%s1132_s4] sm:$0xff]  ;;  %v575_v52 = vld [vmem:[%s1132_s4 + $0x78] sm:$0xff]  ;;  %v574_v53 = vld [vmem:[%s1132_s4 + $0x70] sm:$0xff] }
  0x27   :  { %629 = vmatpush3.msra.mxu0 %v83_v6  ;;  %663 = vmatprep.subr.mxu1 %v849_v1  ;;  %v565_v36 = vld [vmem:[%s1133_s5] ss:$0 sm:$0xff]  ;;  %v158_v41 = vld [vmem:[#allocation5] sm:$0x3]  ;;  %v573_v54 = vld [vmem:[%s1132_s4 + $0x68] sm:$0xff] }
  0x28   :  { %630 = vmatprep.subr.mxu0 %v849_v1  ;;  %664 = vmatpush3.msra.mxu1 %v169_v14  ;;  %v572_v55 = vld [vmem:[%s1132_s4 + $0x60] sm:$0xff]  ;;  %v571_v56 = vld [vmem:[%s1132_s4 + $0x58] sm:$0xff]  ;;  %v570_v57 = vld [vmem:[%s1132_s4 + $0x50] sm:$0xff] }
  0x29   :  { %631 = vmatpush3.msra.mxu0 %v82_v8  ;;  %665 = vmatprep.subr.mxu1 %v849_v1  ;;  %v569_v59 = vld [vmem:[%s1132_s4 + $0x48] sm:$0xff]  ;;  %v294_v60 = vld [vmem:[#allocation2 + $0x2] sm:$0x3]  ;;  %v296_v62 = vld [vmem:[#allocation5 + $0x2] sm:$0x3] }
  0x2a   :  { %632 = vmatprep.subr.mxu0 %v849_v1  ;;  %666 = vmatpush3.msra.mxu1 %v168_v16  ;;  %v568_v61 = vld [vmem:[%s1132_s4 + $0x40] sm:$0xff] }
  0x2b   :  { %633 = vmatpush3.msra.mxu0 %v81_v11  ;;  %667 = vmatprep.subr.mxu1 %v849_v1  ;;  %v577_v5 = vld [vmem:[%s1133_s5 + $0x1] ss:$0 sm:$0xff] }
  0x2c   :  { %634 = vmatprep.subr.mxu0 %v849_v1  ;;  %668 = vmatpush3.msra.mxu1 %v167_v18 }
  0x2d   :  { %635 = vmatpush3.msra.mxu0 %v80_v13  ;;  %669 = vmatprep.subr.mxu1 %v849_v1 }
  0x2e   :  { %636 = vmatprep.subr.mxu0 %v849_v1  ;;  %670 = vmatpush3.msra.mxu1 %v166_v20  ;;  %v435_v20 = vld [vmem:[%s1134_s6 + $0x18] sm:$0xff] }
  0x2f   :  { %637 = vmatpush3.msra.mxu0 %v79_v15  ;;  %671 = vmatprep.subr.mxu1 %v849_v1 }
  0x30   :  { %638 = vmatprep.subr.mxu0 %v849_v1  ;;  %672 = vmatpush3.msra.mxu1 %v165_v31 }
  0x31   :  { %639 = vmatpush3.msra.mxu0 %v78_v17  ;;  %676 = vmatprep.subr.mxu1 %v849_v1 }
  0x32   :  { %640 = vmatprep.subr.mxu0 %v849_v1 }
  0x33   :  { %641 = vmatpush3.msra.mxu0 %v77_v19 }
  0x34   :  { %642 = vmatprep.subr.mxu0 %v849_v1 }
  0x35   :  { %643 = vmatpush3.msra.mxu0 %v76_v21  ;;  %v434_v21 = vld [vmem:[%s1134_s6 + $0x10] sm:$0xff] }
  0x36   :  { %644 = vmatprep.subr.mxu0 %v849_v1 }
  0x37   :  { %645 = vmatpush3.msra.mxu0 %v75_v22  ;;  %v433_v22 = vld [vmem:[%s1134_s6 + $0x8] sm:$0xff] }
  0x38   :  { %646 = vmatprep.subr.mxu0 %v849_v1 }
  0x39   :  { %647 = vmatpush3.msra.mxu0 %v74_v23  ;;  %v432_v23 = vld [vmem:[%s1134_s6] sm:$0xff]  ;;  %s854_s6 = smov [#allocation8]  }
  0x3a   :  { %648 = vmatprep.subr.mxu0 %v849_v1 }
  0x3b   :  { %649 = vmatpush3.msra.mxu0 %v73_v24 }
  0x3c   :  { %650 = vmatprep.subr.mxu0 %v849_v1 }
  0x3d   :  { %651 = vmatpush3.msra.mxu0 %v72_v25 }
  0x3e   :  { %652 = vmatprep.subr.mxu0 %v849_v1 }
  0x3f   :  { %653 = vmatpush3.msra.mxu0 %v71_v26 }
  0x40   :  { %695 = vmatprep.subr.mxu0 %v849_v1 }
  0x9b   :  { %v67_v29 = vpop.permute.xlu0 %66 }
  0x9c   :  { %vm68_vm1 = vcmp.eq.s32.totalorder %v63_v28, %v67_v29 }
  0x9d   :  { %655 = vmatmul.mubr.msk.f32.vlgmr.msra.gmra.mxu0 %vm68_vm1, %v851_v30 }
  0x9e   :  { %703 = vmatprep.mubr.msk.f32.mxu0 %vm850_vm0, %v849_v1  ;;  %696 = vmatpush3.msra.mxu0 %v435_v20 }
  0x9f   :  { %v161_v32 = vpop.permute.xlu0 %160  ;;  %697 = vmatprep.subr.mxu0 %v849_v1 }
  0xa0   :  { %698 = vmatpush3.msra.mxu0 %v434_v21 }
  0xa1   :  { %699 = vmatprep.subr.mxu0 %v849_v1 }
  0xa2   :  { %700 = vmatpush3.msra.mxu0 %v433_v22 }
  0xa3   :  { %701 = vmatprep.subr.mxu0 %v849_v1 }
  0xa4   :  { %702 = vmatpush3.msra.mxu0 %v432_v23 }
 0x15d   :  { %v153_v33 = vpop.f32.mrf.mxu0 }
 0x15e   :  { %v164_v34 = vsel %vm163_vm2, %v153_v33, %v161_v32 }
 0x15f   :  { %v656_v35 = vpop.f32.mrf.mxu0  ;;  %674 = vmatmul.mubr.msk.f32.vlgmr.msra.gmra.mxu1 %vm180_vm3, %v164_v34 }
 0x160   :  { %692 = vmatprep.mubr.msk.f32.mxu1 %vm850_vm0, %v849_v1  ;;  %677 = vmatpush3.msra.mxu1 %v575_v52 }
 0x161   :  { %678 = vmatprep.subr.mxu1 %v849_v1 }
 0x162   :  { %679 = vmatpush3.msra.mxu1 %v574_v53 }
 0x163   :  { %680 = vmatprep.subr.mxu1 %v849_v1 }
 0x164   :  { %681 = vmatpush3.msra.mxu1 %v573_v54 }
 0x165   :  { %682 = vmatprep.subr.mxu1 %v849_v1 }
 0x166   :  { %683 = vmatpush3.msra.mxu1 %v572_v55 }
 0x167   :  { %684 = vmatprep.subr.mxu1 %v849_v1 }
 0x168   :  { %685 = vmatpush3.msra.mxu1 %v571_v56 }
 0x169   :  { %686 = vmatprep.subr.mxu1 %v849_v1 }
 0x16a   :  { %687 = vmatpush3.msra.mxu1 %v570_v57 }
 0x16b   :  { %688 = vmatprep.subr.mxu1 %v849_v1 }
 0x16c   :  { %689 = vmatpush3.msra.mxu1 %v569_v59 }
 0x16d   :  { %690 = vmatprep.subr.mxu1 %v849_v1 }
 0x16e   :  { %691 = vmatpush3.msra.mxu1 %v568_v61 }
 0x21f   :  { %v250_v37 = vpop.f32.mrf.mxu1 }
 0x220   :  { %v251_v38 = vadd.f32 %v565_v36, %v250_v37 }
 0x221   :  { %v675_v39 = vpop.f32.mrf.mxu1 }
 0x222   :  { %720 = vtanh.f32 %v251_v38  ;;  %v567_v42 = vmul.f32 -1.442695, %v251_v38 }
 0x224   :  { %722 = vpow2.f32 %v567_v42 }
 0x22f   :  { %v721_v40 = vpop.eup %720 }
 0x230   :  { %267 = vrot.lane.b32.xlu1 %v721_v40, %s852_s11 }
 0x231   :  { %v723_v43 = vpop.eup %722 }
 0x232   :  { %v257_v44 = vadd.f32 1.0, %v723_v43 }
 0x234   :  { %262 = vrot.lane.b32.xlu1 %v158_v41, %s845_s16  ;;  %724 = vrcp.f32 %v257_v44 }
 0x241   :  { %v725_v45 = vpop.eup %724 }
 0x2a2   :  { %v268_v46 = vpop.permute.xlu1 %267 }
 0x2a3   :  { %v270_v47 = vmul.f32 %v725_v45, %v268_v46 }
 0x2a5   :  { %272 = vrot.lane.b32.xlu0 %v270_v47, %s845_s16 }
 0x2a6   :  { %v263_v48 = vpop.permute.xlu1 %262 }
 0x2a7   :  { %v265_v49 = vmul.f32 %v725_v45, %v263_v48 }
 0x317   :  { %v273_v50 = vpop.permute.xlu0 %272 }
 0x318   :  { %v1042_v51 = vadd.f32 %v273_v50, %v265_v49 }
 0x31a   :  { %726 = vtanh.f32 %v1042_v51 }
 0x327   :  { %v727_v58 = vpop.eup %726 }
 0x328   :  { %278 = vrot.lane.b32.xlu1 %v727_v58, %s852_s11 }
 0x32c   :  { %298 = vrot.lane.b32.xlu1 %v294_v60, %s845_s16 }
 0x330   :  { %400 = vrot.lane.b32.xlu1 %v296_v62, %s845_s16 }
 0x39a   :  { %v279_v63 = vpop.permute.xlu1 %278 }
 0x39b   :  { %v281_v0 = vmul.f32 %v725_v45, %v279_v63 }
 0x39d   :  { %283 = vrot.lane.b32.xlu0 %v281_v0, %s845_s16 }
 0x39e   :  { %v299_v2 = vpop.permute.xlu1 %298 }
 0x3a2   :  { %v401_v16 = vpop.permute.xlu1 %400 }
 0x40f   :  { %v284_v3 = vpop.permute.xlu0 %283 }
 0x410   :  { %287 = vst.msk [vmem:[#allocation8] sm:$0x3] %vm286_vm4, %v284_v3  ;;  %v301_v4 = vsel %vm163_vm2, %v284_v3, %v299_v2 }
 0x411   :  { %693 = vmatmul.mubr.msk.f32.vlgmr.msra.gmra.mxu1 %vm180_vm3, %v301_v4 }
 0x4d1   :  { %v388_v6 = vpop.f32.mrf.mxu1 }
 0x4d2   :  { %v389_v7 = vadd.f32 %v577_v5, %v388_v6 }
 0x4d3   :  { %v694_v8 = vpop.f32.mrf.mxu1 }
 0x4d4   :  { %728 = vtanh.f32 %v389_v7  ;;  %v579_v10 = vmul.f32 -1.442695, %v389_v7 }
 0x4d6   :  { %730 = vpow2.f32 %v579_v10 }
 0x4e1   :  { %v729_v9 = vpop.eup %728 }
 0x4e2   :  { %405 = vrot.lane.b32.xlu0 %v729_v9, %s852_s11 }
 0x4e3   :  { %v731_v11 = vpop.eup %730 }
 0x4e4   :  { %v395_v12 = vadd.f32 1.0, %v731_v11 }
 0x4e6   :  { %732 = vrcp.f32 %v395_v12 }
 0x4f3   :  { %v733_v13 = vpop.eup %732 }
 0x4f4   :  { %v403_v17 = vmul.f32 %v733_v13, %v401_v16 }
 0x554   :  { %v406_v14 = vpop.permute.xlu0 %405 }
 0x555   :  { %v408_v15 = vmul.f32 %v733_v13, %v406_v14 }
 0x557   :  { %410 = vrot.lane.b32.xlu0 %v408_v15, %s845_s16 }
 0x5c9   :  { %v411_v18 = vpop.permute.xlu0 %410 }
 0x5ca   :  { %v413_v19 = vadd.f32 %v411_v18, %v403_v17 }
 0x5cc   :  { %734 = vtanh.f32 %v413_v19 }
 0x5d9   :  { %v735_v24 = vpop.eup %734 }
 0x5da   :  { %416 = vrot.lane.b32.xlu1 %v735_v24, %s852_s11  ;;  %s531_s11 = sshll.u32 %s854_s6, 4  ;;  %s532_s11 = int_to_ptr.vmem [resolvable:$true] %s531_s11 }
 0x5db   :  { %s776_s18 = scalar_lea.vmem %s532_s11, 64  ;;  %p781_p11 = scmp.lt.s32.totalorder %s532_s11, %s532_s11 }
 0x5dc   :  { %p777_p10 = scmp.ne.s32.totalorder %s532_s11, %s776_s18  ;;  %p782_p12 = scmp.lt.s32.totalorder %s776_s18, %s776_s18 }
 0x5de   :  { %289 = vrot.lane.b32.xlu1 %v1042_v51, %s853_s15  ;;  %p783_p13 = por %p782_p12, %p781_p11 }
 0x5e0   :  { %p784_p0 = pnand %p783_p13, %p777_p10 }
 0x64c   :  { %v417_v25 = vpop.permute.xlu1 %416 }
 0x64d   :  { %v419_v26 = vmul.f32 %v733_v13, %v417_v25 }
 0x64f   :  { %421 = vrot.lane.b32.xlu0 %v419_v26, %s845_s16 }
 0x650   :  { %v290_v27 = vpop.permute.xlu1 %289 }
 0x651   :  { %292 = vst.msk [vmem:[#allocation10] sm:$0x3] %vm286_vm4, %v290_v27 }
 0x653   :  { %427 = vrot.lane.b32.xlu0 %v413_v19, %s853_s15 }
 0x6c1   :  { %v422_v28 = vpop.permute.xlu0 %421 }
 0x6c2   :  { %425 = vst.msk [vmem:[#allocation8 + $0x2] sm:$0x3] %vm286_vm4, %v422_v28  ;;  %704 = vmatmul.mubr.msk.f32.vlgmr.msra.gmra.mxu0 %vm163_vm2, %v422_v28 }
 0x6c5   :  { %v428_v1 = vpop.permute.xlu0 %427 }
 0x6c6   :  { %431 = vst.msk [vmem:[#allocation10 + $0x2] sm:$0x3] %vm286_vm4, %v428_v1 }
 0x6c7   :  { %787 = shalt.err (!%p784_p0)
}
 0x6c8   :  { %537 = dma.vmem_to_hbm [thread:$0]  %s532_s11, 64, %s1137_s9, [#allocation9], %s845_s16, %s845_s16, %s846_s17  }
 0x6c9   :  { %s855_s21 = smov [#allocation10]  }
 0x6ca   :  { %s543_s22 = sshll.u32 %s855_s21, 4  ;;  %s544_s22 = int_to_ptr.vmem [resolvable:$true] %s543_s22 }
 0x6cb   :  { %s796_s23 = scalar_lea.vmem %s544_s22, 64  ;;  %p801_p2 = scmp.lt.s32.totalorder %s544_s22, %s544_s22 }
 0x6cc   :  { %p797_p1 = scmp.ne.s32.totalorder %s544_s22, %s796_s23  ;;  %p802_p3 = scmp.lt.s32.totalorder %s796_s23, %s796_s23 }
 0x6ce   :  { %p803_p4 = por %p802_p3, %p801_p2 }
 0x6d0   :  { %p804_p5 = pnand %p803_p4, %p797_p1 }
 0x6d2   :  { %807 = shalt.err (!%p804_p5)
}
 0x6d3   :  { %549 = dma.vmem_to_hbm [thread:$0]  %s544_s22, 64, %s1138_s10, [#allocation9], %s845_s16, %s845_s16, %s846_s17  }
 0x6d4   :  { %v580_v29 = vld [vmem:[%s1135_s7] ss:$0 sm:$0xff]  ;;  %s856_s9 = smov [#allocation7]  }
 0x6d5   :  { %s522_s26 = sshll.u32 %s856_s9, 4  ;;  %s523_s26 = int_to_ptr.vmem [resolvable:$true] %s522_s26 }
 0x6d6   :  { %s816_s27 = scalar_lea.vmem %s523_s26, 32  ;;  %p821_p7 = scmp.lt.s32.totalorder %s523_s26, %s523_s26 }
 0x6d7   :  { %p817_p6 = scmp.ne.s32.totalorder %s523_s26, %s816_s27  ;;  %p822_p8 = scmp.lt.s32.totalorder %s816_s27, %s816_s27 }
 0x6d9   :  { %p823_p9 = por %p822_p8, %p821_p7 }
 0x6db   :  { %p824_p10 = pnand %p823_p9, %p817_p6 }
 0x782   :  { %v511_v30 = vpop.f32.mrf.mxu0 }
 0x783   :  { %v512_v31 = vadd.f32 %v580_v29, %v511_v30 }
 0x784   :  { %v705_v32 = vpop.f32.mrf.mxu0 }
 0x785   :  { %515 = vst [vmem:[#allocation7] sm:$0x3] %v512_v31 }
 0x786   :  { %827 = shalt.err (!%p824_p10)
}
 0x787   :  { %525 = dma.vmem_to_hbm [thread:$0]  %s523_s26, 32, %s1136_s8, [#allocation4]  }
 0x788   :  { %840 = dma.done.wait [#allocation4], 32  }
 0x789   :  { %841 = vsyncadd [#allocation4], 4294967264 }
 0x78a   :  { %842 = dma.done.wait [#allocation9], 128  }
 0x78b   :  { %843 = vsyncadd [#allocation9], 4294967168 }
 0x78c   :  { %559 = vsyncpa [#allocation3], 1 }
 0x78d   :  { %560 = vsyncpa [#allocation6], 1 }
 0x78e   :  { %561 = vsyncpa [#allocation4], 1 }
 0x78f   :  { %562 = vsyncpa [#allocation9], 1 }

</bundles_post_ra>
